<compile_context>
chip_gen: v7x
topology: tpu7x:2x2x1
jax: 0.10.0
libtpu: 0.0.40
codegen_flags: <defaults>
</compile_context>

<pallas_src>
import functools

import jax
import jax.numpy as jnp
from jax import lax
from jax.experimental import pallas as pl
from jax.experimental.pallas import tpu as pltpu


def _ce2d_kernel(logits_ref, tgt_ref, out_ref, acc_ref, *,
                 tiles_per_split, num_blocks, tile_ax, total_ax, ragged):
    sp = pl.program_id(1)                   # parallel split of the tiled axis
    t = pl.program_id(2)                    # block index within this split
    jg = sp * tiles_per_split + t           # global block index along tiled axis

    @pl.when(t == 0)
    def _():
        acc_ref[...] = jnp.zeros_like(acc_ref)

    # (C, ...) logits block; promote to f32 for stable log-sum-exp math.
    logits = logits_ref[...].astype(jnp.float32)
    tgt = tgt_ref[...]                      # (1, ...) int32 class indices

    # Channel axis is the LEADING (non-tiled) axis, so these reductions are
    # plain elementwise VALU ops across vreg sets (no XLU shuffles).
    m = jnp.max(logits, axis=0, keepdims=True)
    shifted = logits - m                    # reused by exp() and the one-hot select
    # NOTE: for very large C on v6e/v7x, exp in bf16 would double EUP
    # throughput; kept f32 for accuracy and v5e compatibility.
    lse = jnp.log(jnp.sum(jnp.exp(shifted), axis=0, keepdims=True))
    ch = lax.broadcasted_iota(jnp.int32, shifted.shape, 0)
    tgt_shift = jnp.sum(jnp.where(ch == tgt, shifted, 0.0), axis=0, keepdims=True)
    # nll = logsumexp(l) - l_t = lse_shift - (l_t - m)
    nll = lse - tgt_shift                   # (1, ...) per-pixel NLL

    def accumulate(masked):
        def body():
            upd = nll
            if masked:
                # Only the global last block can be ragged; mask positions >= total_ax.
                idx = jg * tile_ax + lax.broadcasted_iota(jnp.int32, nll.shape, 1)
                upd = jnp.where(idx < total_ax, nll, 0.0)
            acc_ref[...] += upd
        return body

    if ragged:
        pl.when(jg == num_blocks - 1)(accumulate(True))
        pl.when(jg != num_blocks - 1)(accumulate(False))
    else:
        accumulate(False)()

    @pl.when(t == tiles_per_split - 1)
    def _():
        acc = acc_ref[...]
        if acc.ndim == 3:                   # dense path: (1, rows, 128)
            acc = jnp.sum(acc, axis=1)      # -> (1, 128)
        out_ref[...] = jnp.sum(acc, keepdims=True)   # -> (1, 1)


def _vmem_budget_bytes():
    """Generation-aware VMEM budget with ~30% headroom for double buffering."""
    try:
        vmem = int(pltpu.get_tpu_info().vmem_capacity_bytes)
        # ~45 MiB on v7x (64 MiB/TC), ~90-100 MiB on v5e/v6e (128 MiB).
        return int(min(max(vmem * 7 // 10, 32 * 1024 * 1024), 100 * 1024 * 1024))
    except Exception:
        return 48 * 1024 * 1024             # conservative: safe on every generation


def _plan_lanes(c, itemsize, target_block_bytes, budget_bytes):
    """Lane count (pixels) per grid step: bytes-per-step target, VMEM-capped."""
    # Per-lane VMEM bytes: double-buffered logits + double-buffered int32
    # targets + f32 acc + live f32 temporaries (~4 C-sized slabs: upcast,
    # shifted, exp, one-hot/iota) + ~6 per-pixel f32/int32 vectors.
    per_lane = 2 * c * itemsize + 2 * 4 + 4 + 4 * c * 4 + 24
    vmem_lanes = budget_bytes // per_lane
    target_lanes = target_block_bytes // (c * itemsize)
    lanes = int(min(vmem_lanes, target_lanes))
    return max((lanes // 128) * 128, 128)


def cross_entropy_loss_2d(outputs, targets, *,
                          target_block_bytes=2 * 1024 * 1024, max_lanes=None):
    """outputs: [N, C, H, W] float; targets: [N, 1, H, W] int class indices.

    Returns a scalar float32 equal to
        nn.NLLLoss()(F.log_softmax(outputs, dim=1), targets[:, 0, :, :]).
    """
    N, C, H, W = outputs.shape
    assert targets.shape == (N, 1, H, W)
    HW = H * W
    itemsize = jnp.dtype(outputs.dtype).itemsize

    budget = _vmem_budget_bytes()
    lanes = _plan_lanes(C, itemsize, target_block_bytes, budget)
    if max_lanes is not None:               # test/tuning override
        lanes = max(min(lanes, (max_lanes // 128) * 128), 128)

    tgt = targets.astype(jnp.int32)

    if HW % 128 == 0:
        # Dense path: re-block HW as (rows, 128) so per-pixel math fills whole
        # (8,128) vregs; free contiguous reshape, no padding.
        rows_total = HW // 128
        rows_cap = max(((lanes // 128) // 8) * 8, 8)
        rows_per_tile = rows_total if rows_total <= rows_cap else rows_cap
        num_blocks = pl.cdiv(rows_total, rows_per_tile)
        ragged = (rows_total % rows_per_tile) != 0
        tile_ax, total_ax = rows_per_tile, rows_total
        logits_in = outputs.reshape(N, C, rows_total, 128)
        tgt_in = tgt.reshape(N, 1, rows_total, 128)
        pix_block = (rows_per_tile, 128)

        def make_in_specs(tps):
            return [
                pl.BlockSpec((None, C, rows_per_tile, 128),
                             lambda n, s, t: (n, 0, s * tps + t, 0)),
                pl.BlockSpec((None, 1, rows_per_tile, 128),
                             lambda n, s, t: (n, 0, s * tps + t, 0)),
            ]
    else:
        # Ragged lane path: (N, C, HW) with lane tiling; tail handled by an
        # in-kernel mask emitted only for the final block.
        tile = HW if HW <= lanes else lanes
        num_blocks = pl.cdiv(HW, tile)
        ragged = (HW % tile) != 0
        tile_ax, total_ax = tile, HW
        logits_in = outputs.reshape(N, C, HW)
        tgt_in = tgt.reshape(N, 1, HW)
        pix_block = (tile,)

        def make_in_specs(tps):
            return [
                pl.BlockSpec((None, C, tile), lambda n, s, t: (n, 0, s * tps + t)),
                pl.BlockSpec((None, 1, tile), lambda n, s, t: (n, 0, s * tps + t)),
            ]

    # v7x has 2 TensorCores: if the batch axis alone cannot feed both, add a
    # parallel split of the tiled axis (when the block count divides evenly).
    splits = 2 if (N == 1 and num_blocks >= 2 and num_blocks % 2 == 0) else 1
    tps = num_blocks // splits

    kernel = functools.partial(
        _ce2d_kernel, tiles_per_split=tps, num_blocks=num_blocks,
        tile_ax=tile_ax, total_ax=total_ax, ragged=ragged)

    partial_sums = pl.pallas_call(
        kernel,
        out_shape=jax.ShapeDtypeStruct((N, splits, 1, 1), jnp.float32),
        grid_spec=pltpu.PrefetchScalarGridSpec(
            num_scalar_prefetch=0,
            grid=(N, splits, tps),
            in_specs=make_in_specs(tps),
            out_specs=pl.BlockSpec((None, None, 1, 1),
                                   lambda n, s, t: (n, s, 0, 0)),
            scratch_shapes=[pltpu.VMEM((1,) + pix_block, jnp.float32)],
        ),
        compiler_params=pltpu.CompilerParams(
            dimension_semantics=("parallel", "parallel", "arbitrary"),
            vmem_limit_bytes=int(budget),
        ),
    )(logits_in, tgt_in)

    # Tiny (N*splits,) final reduction + mean normalization in the wrapper.
    return jnp.sum(partial_sums) / jnp.float32(N * HW)


def _reference(outputs, targets):
    logp = jax.nn.log_softmax(outputs, axis=1)
    t = targets[:, 0, :, :]
    nll = -jnp.take_along_axis(logp, t[:, None, :, :], axis=1)[:, 0]
    return jnp.mean(nll)


if __name__ == "__main__":
    key = jax.random.PRNGKey(0)
    keys = jax.random.split(key, 8)

    # 1) Module's expected small shapes (dense vreg path, single block).
    N, C, H, W = 2, 4, 16, 16
    outputs = jax.random.normal(keys[0], (N, C, H, W), dtype=jnp.float32)
    targets = jax.random.randint(keys[1], (N, 1, H, W), 0, C, dtype=jnp.int32)
    loss = jax.block_until_ready(cross_entropy_loss_2d(outputs, targets))
    ref = _reference(outputs, targets)
    assert jnp.allclose(loss, ref, rtol=1e-5, atol=1e-5), (loss, ref)

    # 2) Ragged lane path: HW=144 with a forced 128-lane tile -> 2 blocks,
    #    last one partial, handled purely by the masked-last-block branch.
    H2 = W2 = 12
    outputs2 = jax.random.normal(keys[2], (N, C, H2, W2), dtype=jnp.float32)
    targets2 = jax.random.randint(keys[3], (N, 1, H2, W2), 0, C, dtype=jnp.int32)
    loss2 = jax.block_until_ready(
        cross_entropy_loss_2d(outputs2, targets2, max_lanes=128))
    ref2 = _reference(outputs2, targets2)
    assert jnp.allclose(loss2, ref2, rtol=1e-5, atol=1e-5), (loss2, ref2)

    # 3) Dense path + N==1 parallel split: HW=4096 (32 rows), forced 8-row
    #    tiles -> 4 blocks, split 2x2 across the parallel axis (v7x 2 TCs).
    H3 = W3 = 64
    outputs3 = jax.random.normal(keys[4], (1, C, H3, W3), dtype=jnp.float32)
    targets3 = jax.random.randint(keys[5], (1, 1, H3, W3), 0, C, dtype=jnp.int32)
    loss3 = jax.block_until_ready(
        cross_entropy_loss_2d(outputs3, targets3, max_lanes=1024))
    ref3 = _reference(outputs3, targets3)
    assert jnp.allclose(loss3, ref3, rtol=1e-5, atol=1e-5), (loss3, ref3)

    # 4) Dense ragged-row path: HW=2304 (18 rows), 8-row tiles -> 3 blocks,
    #    last one has only 2 valid rows (masked in the final block only).
    H4 = W4 = 48
    outputs4 = jax.random.normal(keys[6], (N, C, H4, W4), dtype=jnp.float32)
    targets4 = jax.random.randint(keys[7], (N, 1, H4, W4), 0, C, dtype=jnp.int32)
    loss4 = jax.block_until_ready(
        cross_entropy_loss_2d(outputs4, targets4, max_lanes=1024))
    ref4 = _reference(outputs4, targets4)
    assert jnp.allclose(loss4, ref4, rtol=1e-5, atol=1e-5), (loss4, ref4)

    print("KERNEL_OK")
</pallas_src>

<mosaic_0001>
module attributes {stable_mosaic.version = 11 : i64} {
  func.func @_ce2d_kernel(%arg0: i32, %arg1: i32, %arg2: i32, %arg3: memref<1x4x2x128xf32, #tpu.memory_space<vmem>>, %arg4: memref<1x1x2x128xi32, #tpu.memory_space<vmem>>, %arg5: memref<1x1x1x1xf32, #tpu.memory_space<vmem>>, %arg6: memref<1x2x128xf32, #tpu.memory_space<vmem>>) attributes {dimension_semantics = [#tpu.dimension_semantics<parallel>, #tpu.dimension_semantics<parallel>, #tpu.dimension_semantics<arbitrary>], iteration_bounds = array<i64: 2, 1, 1>, scalar_prefetch = 0 : i64, scratch_operands = 1 : i64, tpu.core_type = #tpu.core_type<tc>, window_params = [{transform_indices = @transform_0, window_bounds = array<i64: 1, 4, 2, 128>}, {transform_indices = @transform_1, window_bounds = array<i64: 1, 1, 2, 128>}, {transform_indices = @transform_2, window_bounds = array<i64: 1, 1, 1, 1>}]} {
    %c0_i32 = arith.constant 0 : i32
    %0 = arith.cmpi eq, %arg2, %c0_i32 : i32
    %1 = arith.extui %0 : i1 to i32
    %c0_i32_0 = arith.constant 0 : i32
    %2 = arith.cmpi ne, %1, %c0_i32_0 : i32
    scf.if %2 {
      %cst_19 = arith.constant 0.000000e+00 : f32
      %29 = vector.broadcast %cst_19 : f32 to vector<1x2x128xf32>
      %c0_20 = arith.constant 0 : index
      %c0_21 = arith.constant 0 : index
      %c0_22 = arith.constant 0 : index
      %30 = vector.load %arg6[%c0_20, %c0_21, %c0_22] : memref<1x2x128xf32, #tpu.memory_space<vmem>>, vector<1x2x128xf32>
      tpu.vector_store %arg6[%c0_20, %c0_21, %c0_22], %29 {strides = array<i32>} : memref<1x2x128xf32, #tpu.memory_space<vmem>>, vector<1x2x128xf32>,
    } else {
    }
    %c0 = arith.constant 0 : index
    %c0_1 = arith.constant 0 : index
    %c0_2 = arith.constant 0 : index
    %c0_3 = arith.constant 0 : index
    %3 = vector.load %arg3[%c0, %c0_1, %c0_2, %c0_3] : memref<1x4x2x128xf32, #tpu.memory_space<vmem>>, vector<1x4x2x128xf32>
    %4 = vector.shape_cast %3 : vector<1x4x2x128xf32> to vector<4x2x128xf32>
    %c0_4 = arith.constant 0 : index
    %c0_5 = arith.constant 0 : index
    %c0_6 = arith.constant 0 : index
    %c0_7 = arith.constant 0 : index
    %5 = vector.load %arg4[%c0_4, %c0_5, %c0_6, %c0_7] : memref<1x1x2x128xi32, #tpu.memory_space<vmem>>, vector<1x1x2x128xi32>
    %6 = vector.shape_cast %5 : vector<1x1x2x128xi32> to vector<1x2x128xi32>
    %cst = arith.constant dense<0xFF800000> : vector<2x128xf32>
    %7 = vector.multi_reduction <maximumf>, %4, %cst [0] : vector<4x2x128xf32> to vector<2x128xf32>
    %8 = vector.shape_cast %7 : vector<2x128xf32> to vector<1x2x128xf32>
    %9 = vector.broadcast %8 : vector<1x2x128xf32> to vector<4x2x128xf32>
    %10 = arith.subf %4, %9 : vector<4x2x128xf32>
    %11 = math.exp %10 : vector<4x2x128xf32>
    %cst_8 = arith.constant dense<0.000000e+00> : vector<2x128xf32>
    %12 = vector.multi_reduction <add>, %11, %cst_8 [0] : vector<4x2x128xf32> to vector<2x128xf32>
    %13 = vector.shape_cast %12 : vector<2x128xf32> to vector<1x2x128xf32>
    %14 = math.log %13 : vector<1x2x128xf32>
    %15 = tpu.iota {dimensions = array<i32: 0>} : vector<4x2x128xi32>
    %16 = vector.broadcast %6 : vector<1x2x128xi32> to vector<4x2x128xi32>
    %17 = arith.cmpi eq, %15, %16 : vector<4x2x128xi32>
    %cst_9 = arith.constant 0.000000e+00 : f32
    %18 = vector.broadcast %cst_9 : f32 to vector<4x2x128xf32>
    %19 = arith.select %17, %10, %18 : vector<4x2x128xi1>, vector<4x2x128xf32>
    %cst_10 = arith.constant dense<0.000000e+00> : vector<2x128xf32>
    %20 = vector.multi_reduction <add>, %19, %cst_10 [0] : vector<4x2x128xf32> to vector<2x128xf32>
    %21 = vector.shape_cast %20 : vector<2x128xf32> to vector<1x2x128xf32>
    %22 = arith.subf %14, %21 : vector<1x2x128xf32>
    %c0_11 = arith.constant 0 : index
    %c0_12 = arith.constant 0 : index
    %c0_13 = arith.constant 0 : index
    %23 = vector.load %arg6[%c0_11, %c0_12, %c0_13] : memref<1x2x128xf32, #tpu.memory_space<vmem>>, vector<1x2x128xf32>
    %24 = arith.addf %23, %22 : vector<1x2x128xf32>
    %c0_14 = arith.constant 0 : index
    %c0_15 = arith.constant 0 : index
    %c0_16 = arith.constant 0 : index
    %25 = vector.load %arg6[%c0_14, %c0_15, %c0_16] : memref<1x2x128xf32, #tpu.memory_space<vmem>>, vector<1x2x128xf32>
    tpu.vector_store %arg6[%c0_14, %c0_15, %c0_16], %24 {strides = array<i32>} : memref<1x2x128xf32, #tpu.memory_space<vmem>>, vector<1x2x128xf32>,
    %c0_i32_17 = arith.constant 0 : i32
    %26 = arith.cmpi eq, %arg2, %c0_i32_17 : i32
    %27 = arith.extui %26 : i1 to i32
    %c0_i32_18 = arith.constant 0 : i32
    %28 = arith.cmpi ne, %27, %c0_i32_18 : i32
    scf.if %28 {
      %c0_19 = arith.constant 0 : index
      %c0_20 = arith.constant 0 : index
      %c0_21 = arith.constant 0 : index
      %29 = vector.load %arg6[%c0_19, %c0_20, %c0_21] : memref<1x2x128xf32, #tpu.memory_space<vmem>>, vector<1x2x128xf32>
      %cst_22 = arith.constant dense<0.000000e+00> : vector<1x128xf32>
      %30 = vector.multi_reduction <add>, %29, %cst_22 [1] : vector<1x2x128xf32> to vector<1x128xf32>
      %31 = vector.shape_cast %30 : vector<1x128xf32> to vector<1x1x128xf32>
      %cst_23 = arith.constant dense<0.000000e+00> : vector<1xf32>
      %32 = vector.multi_reduction <add>, %31, %cst_23 [1, 2] : vector<1x1x128xf32> to vector<1xf32>
      %33 = vector.shape_cast %32 : vector<1xf32> to vector<1x1x1xf32>
      %34 = vector.extract %33[0, 0, 0] : f32 from vector<1x1x1xf32>
      %35 = vector.broadcast %34 : f32 to vector<1x1xf32>
      %c0_24 = arith.constant 0 : index
      %c0_25 = arith.constant 0 : index
      %c0_26 = arith.constant 0 : index
      %c0_27 = arith.constant 0 : index
      %36 = vector.load %arg5[%c0_24, %c0_25, %c0_26, %c0_27] : memref<1x1x1x1xf32, #tpu.memory_space<vmem>>, vector<1x1x1x1xf32>
      %37 = vector.shape_cast %36 : vector<1x1x1x1xf32> to vector<1x1xf32>
      %38 = vector.shape_cast %35 : vector<1x1xf32> to vector<1x1x1x1xf32>
      tpu.vector_store %arg5[%c0_24, %c0_25, %c0_26, %c0_27], %38 {strides = array<i32>} : memref<1x1x1x1xf32, #tpu.memory_space<vmem>>, vector<1x1x1x1xf32>,
    } else {
    }
    return
  }
  func.func @transform_0(%arg0: i32, %arg1: i32, %arg2: i32) -> (i32, i32, i32, i32) {
    %c1_i32 = arith.constant 1 : i32
    %0 = arith.muli %arg1, %c1_i32 : i32
    %1 = arith.addi %0, %arg2 : i32
    %c0_i32 = arith.constant 0 : i32
    %c0_i32_0 = arith.constant 0 : i32
    %c0_i32_1 = arith.constant 0 : i32
    return %arg0, %c0_i32, %1, %c0_i32_0 : i32, i32, i32, i32
  }
  func.func @transform_1(%arg0: i32, %arg1: i32, %arg2: i32) -> (i32, i32, i32, i32) {
    %c1_i32 = arith.constant 1 : i32
    %0 = arith.muli %arg1, %c1_i32 : i32
    %1 = arith.addi %0, %arg2 : i32
    %c0_i32 = arith.constant 0 : i32
    %c0_i32_0 = arith.constant 0 : i32
    %c0_i32_1 = arith.constant 0 : i32
    return %arg0, %c0_i32, %1, %c0_i32_0 : i32, i32, i32, i32
  }
  func.func @transform_2(%arg0: i32, %arg1: i32, %arg2: i32) -> (i32, i32, i32, i32) {
    %c0_i32 = arith.constant 0 : i32
    %c0_i32_0 = arith.constant 0 : i32
    %c0_i32_1 = arith.constant 0 : i32
    return %arg0, %arg1, %c0_i32, %c0_i32_0 : i32, i32, i32, i32
  }
}

</mosaic_0001>

<bundles_post_ra>
// kernel: tpu_custom_call.1
= control target key start
LH: loop header
LB: loop body
LE: loop exit
PB: predicated region body
PF: predicated region fallthrough
CT: control target
= control target key end

     0   :  { %7 = vsyncpa [#allocation4], 0  ;;  %s832_s0 = inlined_call_operand.hbm [shape: f32[2,4,2,128], index: 0, kind: input, shape index: {}]   ;;  %s833_s1 = inlined_call_operand.hbm [shape: s32[2,1,2,128], index: 1, kind: input, shape index: {}]   ;;  %s834_s2 = inlined_call_operand.vmem [shape: f32[2,1,1,1], index: 2, kind: output, shape index: {}]  }
   0x1   :  { %9 = vsyncpa [#allocation4 + $0x1], 0 }
   0x2   :  { %10 = vsyncpa [#allocation6], 0 }
   0x3   :  { %12 = vsyncpa [#allocation6 + $0x1], 0  ;;  %s655_s9 = smov 0   ;;  %s657_s10 = smov 0  }
   0x4   :  { %s659_s11 = smov 0   ;;  %s661_s12 = smov 0  }
   0x5   :  { %s663_s13 = smov 0   ;;  %s665_s14 = smov 0  }
   0x6 LB: > { %s429_s15 = sadd.s32 4294967295, %s633_s14   ;;  %s37_s16 = sadd.s32 1, %s629_s13  ;;  %s633_s14 = sphi %s665_s14, %s18_s14   ;;  %s629_s13 = sphi %s663_s13, %s846_s13   ;;  %s625_s12 = sphi %s661_s12, %s845_s12   ;;  %s621_s11 = sphi %s659_s11, %s844_s11   ;;  %s617_s10 = sphi %s657_s10, %s843_s10   ;;  %s613_s9 = sphi %s655_s9, %s842_s9  }
   0x7   : > { %p39_p0 = scmp.ge.s32.totalorder %s37_s16, 2  ;;  %s48_s17 = sadd.s32 1, %s621_s11 }
   0x8   : > { %p55_p1 = scmp.ne.s32.totalorder %s621_s11, %s617_s10  ;;  %p56_p2 = scmp.eq.s32.totalorder %s633_s14, 0 }
   0x9   : > { %s848_s16 = smov (%p39_p0, %s37_s16), 0  ;;  %p61_p4 = scmp.ne.s32.totalorder %s617_s10, %s613_s9 }
   0xa   : > { %p691_p3 = por %p56_p2, %p55_p1  ;;  %s43_s19 = ssub.s32 %s629_s13, %s848_s16 }
   0xb   : > { %p62_p5 = scmp.eq.s32.totalorder %s429_s15, 0  ;;  %p46_p6 = scmp.eq.s32.totalorder %s43_s19, 0 }
   0xc   : > { %p457_p8 = scmp.lt.s32.totalorder %s633_s14, 2  ;;  %s707_s22 = sand.u32 1, %s621_s11  }
   0xd   : > { %p698_p7 = por %p62_p5, %p61_p4  ;;  %s443_s23 = sshll.u32 %s629_s13, 7 }
   0xe   : > { %s704_s21 = scalar_select %p46_p6, %s621_s11, %s48_s17  }
   0xf   : > { %s837_s20 = scalar_select %p698_p7, 1, 0 }
  0x10   : > { %s433_s24 = sshll.u32 %s707_s22, 3  ;;  %s714_s27 = scalar_lea.hbm %s832_s0, %s443_s23 }
  0x11   : > { %s147_s28 = scalar_lea.vmem [#allocation3], %s433_s24  ;;  %p718_p9 = pnand %p457_p8, %p691_p3 }
  0x12   : > { %s156_s29 = sshll.u32 %s147_s28, 4  ;;  %s144_s3 = scalar_lea.sflag [#allocation4], %s707_s22  ;;  %s722_s29 = int_to_ptr.vmem [resolvable:$true] %s156_s29 }
  0x13   : > { %s519_s4 = scalar_lea.hbm %s714_s27, 128  ;;  %p521_p11 = pneg %p718_p9 }
  0x14   : > { %p520_p10 = scmp.ne.s32.totalorder %s714_s27, %s519_s4  ;;  %s524_s7 = scalar_lea.hbm %s832_s0, 256 }
  0x15   : > { %p525_p0 = scmp.lt.u32.totalorder %s714_s27, %s832_s0  ;;  %p526_p1 = scmp.lt.u32.totalorder %s524_s7, %s519_s4 }
  0x16   : > { %p522_p12 = pnand %p521_p11, %p520_p10  ;;  %p528_p3 = scmp.lt.u32.totalorder %s519_s4, %s714_s27 }
  0x17   : > { %p527_p2 = por %p526_p1, %p525_p0 }
  0x18   : > { %p523_p13 = pneg %p522_p12 }
  0x19   : > { %p529_p4 = por %p528_p3, %p527_p2 }
  0x1b   : > { %p530_p5 = pnand %p529_p4, %p523_p13 }
  0x1d   : > { %533 = shalt.err (!%p530_p5)
}
  0x1e   : > { %s534_s15 = scalar_lea.vmem %s722_s29, 128  ;;  %s635_s17 = smov [#allocation3]  }
  0x1f   : > { %p535_p6 = scmp.ne.s32.totalorder %s722_s29, %s534_s15  ;;  %s539_s18 = sshll.u32 %s635_s17, 4  ;;  %s540_s18 = int_to_ptr.vmem [resolvable:$false] %s539_s18 }
  0x20   : > { %s541_s19 = scalar_lea.vmem %s540_s18, 256  ;;  %p542_p12 = scmp.lt.s32.totalorder %s722_s29, %s540_s18 }
  0x21   : > { %p537_p8 = pnand %p535_p6, %p521_p11  ;;  %p543_p0 = scmp.lt.s32.totalorder %s541_s19, %s534_s15 }
  0x23   : > { %p538_p10 = pneg %p537_p8  ;;  %p544_p1 = por %p543_p0, %p542_p12 }
  0x25   : > { %p545_p2 = pnand %p544_p1, %p538_p10 }
  0x27   : > { %548 = shalt.err (!%p545_p2)
}
  0x28   : > { %s636_s23 = smov 32   ;;  %s637_s24 = smov 2  }
  0x29   : > { %453 = dma.hbm_to_vmem [thread:$0]  (!%p718_p9), %s714_s27, 128, %s722_s29, %s144_s3, %s636_s23, %s636_s23, %s637_s24  }
  0x2a   : > { %p438_p13 = scmp.ge.s32.totalorder %s633_s14, 1  ;;  %p184_p3 = scmp.lt.s32.totalorder %s633_s14, 3 }
  0x2b   : > { %s436_s25 = sshll.u32 %s707_s22, 1  ;;  %s437_s28 = sshll.u32 %s629_s13, 5 }
  0x2c   : > { %p755_p4 = pnand %p438_p13, %p184_p3  ;;  %s170_s4 = scalar_lea.vmem [#allocation5], %s436_s25 }
  0x2d   : > { %s179_s5 = sshll.u32 %s170_s4, 4  ;;  %s763_s8 = scalar_lea.hbm %s833_s1, %s437_s28  ;;  %s180_s5 = int_to_ptr.vmem [resolvable:$true] %s179_s5 }
  0x2e   : > { %s839_s26 = scalar_select %p755_p4, 1, 0 }
  0x2f   : > { %s167_s27 = scalar_lea.sflag [#allocation6], %s707_s22  ;;  %s549_s29 = scalar_lea.hbm %s763_s8, 32 }
  0x30   : > { %p550_p5 = scmp.ne.s32.totalorder %s763_s8, %s549_s29  ;;  %s554_s15 = scalar_lea.hbm %s833_s1, 64 }
  0x31   : > { %p555_p10 = scmp.lt.u32.totalorder %s763_s8, %s833_s1  ;;  %p556_p12 = scmp.lt.u32.totalorder %s554_s15, %s549_s29 }
  0x32   : > { %p552_p6 = pnand %p550_p5, %p521_p11  ;;  %p558_p1 = scmp.lt.u32.totalorder %s549_s29, %s763_s8 }
  0x33   : > { %p557_p0 = por %p556_p12, %p555_p10 }
  0x34   : > { %p553_p8 = pneg %p552_p6 }
  0x35   : > { %p559_p2 = por %p558_p1, %p557_p0 }
  0x37   : > { %p560_p13 = pnand %p559_p2, %p553_p8 }
  0x39   : > { %563 = shalt.err (!%p560_p13)
}
  0x3a   : > { %s564_s22 = scalar_lea.vmem %s180_s5, 32  ;;  %s638_s19 = smov [#allocation5]  }
  0x3b   : > { %p565_p3 = scmp.ne.s32.totalorder %s180_s5, %s564_s22  ;;  %s569_s23 = sshll.u32 %s638_s19, 4  ;;  %s570_s23 = int_to_ptr.vmem [resolvable:$false] %s569_s23 }
  0x3c   : > { %s571_s24 = scalar_lea.vmem %s570_s23, 64  ;;  %p572_p7 = scmp.lt.s32.totalorder %s180_s5, %s570_s23 }
  0x3d   : > { %p567_p5 = pnand %p565_p3, %p521_p11  ;;  %p573_p4 = scmp.lt.s32.totalorder %s571_s24, %s564_s22 }
  0x3f   : > { %p568_p6 = pneg %p567_p5  ;;  %p574_p10 = por %p573_p4, %p572_p7 }
  0x41   : > { %p575_p12 = pnand %p574_p10, %p568_p6 }
  0x43   : > { %578 = shalt.err (!%p575_p12)
}
  0x44   : > { %456 = dma.hbm_to_vmem [thread:$0]  (!%p718_p9), %s763_s8, 32, %s180_s5, %s167_s27  }
  0x45   : > { %p840_p8 = scmp.ne.s32.totalorder %s839_s26, 0 }
  0x46   : > { %s190_s25 = sand.u32 (!%p840_p8), 1, %s617_s10   ;;  %p841_p11 = scmp.ne.s32.totalorder (!%p840_p8), %s837_s20, 0 }
  0x47   : > { %188 = sbr.rel (%p840_p8) target bundleno = 358 (0x166), region = 28  ;;  %s439_s28 = sshll.u32 (!%p840_p8), %s190_s25, 3 }
  0x48   : > { %s191_s4 = scalar_lea.sflag (!%p840_p8), [#allocation4], %s190_s25  ;;  %s194_s6 = scalar_lea.vmem (!%p840_p8), [#allocation3], %s439_s28 }
  0x4e   : > { %604 = dma.done.wait (%p841_p11), %s191_s4, 128  }
  0x4f   : > { %606 = vsyncadd (%p841_p11), %s191_s4, 4294967168  ;;  %s440_s7 = sshll.u32 %s190_s25, 1  ;;  %s200_s29 = scalar_lea.sflag [#allocation6], %s190_s25 }
  0x50   : > { %s203_s30 = scalar_lea.vmem [#allocation5], %s440_s7 }
  0x51   : > { %608 = dma.done.wait (%p841_p11), %s200_s29, 32  }
  0x52   : > { %610 = vsyncadd (%p841_p11), %s200_s29, 4294967264  ;;  %v639_v0 = vmov 0.0   ;;  %vm248_vm0 = vcmask 1041408   ;;  %v243_v1 = vld [vmem:[%s194_s6] sm:$0x3]  ;;  %vm307_vm5 = vcmask 1040384  }
  0x53   : > { %242 = vst [vmem:[#allocation2] sm:$0x3] %v639_v0  ;;  %v244_v2 = vld [vmem:[%s194_s6 + $0x2] sm:$0x3]  ;;  %v245_v3 = vld [vmem:[%s194_s6 + $0x4] sm:$0x3] }
  0x54   : > { %v246_v4 = vld [vmem:[%s194_s6 + $0x6] sm:$0x3]  ;;  %v249_v5 = vsel %vm248_vm0, %v243_v1, -inf  ;;  %v250_v6 = vsel %vm248_vm0, %v244_v2, -inf  ;;  %v251_v7 = vsel %vm248_vm0, %v245_v3, -inf  ;;  %p232_p7 = scmp.lt.s32.totalorder %s625_s12, 1 }
  0x55   : > { %v252_v8 = vsel %vm248_vm0, %v246_v4, -inf  ;;  %v253_v9 = vmax.f32 %v249_v5, %v250_v6  ;;  %v247_v20 = vld [vmem:[%s203_s30] sm:$0x3]  ;;  %vm319_vm6 = vcmask 0  }
  0x56   : > { %v254_v10 = vmax.f32 %v251_v7, %v252_v8  ;;  %vm277_vm1 = vcmp.eq.s32.totalorder %v247_v20, 0  ;;  %vm278_vm2 = vcmp.eq.s32.totalorder %v247_v20, 1  ;;  %vm279_vm3 = vcmp.eq.s32.totalorder %v247_v20, 2  ;;  %s850_s12 = smov (!%p232_p7, %s625_s12), 1 }
  0x57   : > { %vm280_vm4 = vcmp.eq.s32.totalorder %v247_v20, 3  ;;  %s237_s5 = scalar_lea.vmem %s834_s2, %s850_s12 }
  0x58   : > { %v255_v11 = vmax.f32 %v253_v9, %v254_v10 }
  0x5a   : > { %v256_v12 = vsub.f32 %v243_v1, %v255_v11  ;;  %v257_v13 = vsub.f32 %v244_v2, %v255_v11  ;;  %v258_v14 = vsub.f32 %v245_v3, %v255_v11  ;;  %v259_v15 = vsub.f32 %v246_v4, %v255_v11  ;;  %v293_v45 = vld [vmem:[#allocation2] sm:$0x3] }
  0x5c   : > { %v260_v16 = vmul.f32 1.442695, %v256_v12  ;;  %v262_v17 = vmul.f32 1.442695, %v257_v13  ;;  %v264_v18 = vmul.f32 1.442695, %v258_v14 }
  0x5d   : > { %v266_v19 = vmul.f32 1.442695, %v259_v15  ;;  %v281_v30 = vsel %vm277_vm1, %v256_v12, 0.0  ;;  %v282_v31 = vsel %vm278_vm2, %v257_v13, 0.0  ;;  %v283_v36 = vsel %vm279_vm3, %v258_v14, 0.0 }
  0x5e   : > { %509 = vpow2.f32 %v260_v16  ;;  %v285_v34 = vsel %vm248_vm0, %v281_v30, 0.0  ;;  %v286_v35 = vsel %vm248_vm0, %v282_v31, 0.0  ;;  %v288_v38 = vsel %vm248_vm0, %v283_v36, 0.0 }
  0x5f   : > { %511 = vpow2.f32 %v262_v17  ;;  %v287_v37 = vadd.f32 %v286_v35, %v285_v34  ;;  %v284_v39 = vsel %vm280_vm4, %v259_v15, 0.0 }
  0x60   : > { %513 = vpow2.f32 %v264_v18  ;;  %v290_v41 = vsel %vm248_vm0, %v284_v39, 0.0 }
  0x61   : > { %515 = vpow2.f32 %v266_v19  ;;  %v289_v40 = vadd.f32 %v288_v38, %v287_v37 }
  0x63   : > { %v291_v42 = vadd.f32 %v290_v41, %v289_v40 }
  0x68   : > { %v510_v21 = vpop.eup %509 }
  0x69   : > { %v512_v22 = vpop.eup %511  ;;  %v268_v23 = vsel %vm248_vm0, %v510_v21, 0.0 }
  0x6a   : > { %v514_v24 = vpop.eup %513  ;;  %v269_v25 = vsel %vm248_vm0, %v512_v22, 0.0 }
  0x6b   : > { %v516_v26 = vpop.eup %515  ;;  %v270_v27 = vadd.f32 %v269_v25, %v268_v23  ;;  %v271_v28 = vsel %vm248_vm0, %v514_v24, 0.0 }
  0x6c   : > { %v273_v29 = vsel %vm248_vm0, %v516_v26, 0.0 }
  0x6d   : > { %v272_v32 = vadd.f32 %v271_v28, %v270_v27 }
  0x6f   : > { %v274_v33 = vadd.f32 %v273_v29, %v272_v32 }
  0x71   : > { %517 = vlog2.f32 %v274_v33 }
  0x7b   : > { %v518_v43 = vpop.eup %517 }
  0x7c   : > { %v276_v44 = vmul.f32 0.6931472, %v518_v43 }
  0x7e   : > { %v292_v46 = vsub.f32 %v276_v44, %v291_v42 }
  0x80   : > { %v294_v47 = vadd.f32 %v293_v45, %v292_v46 }
  0x82   : > { %295 = vst [vmem:[#allocation2] sm:$0x3] %v294_v47 }
  0x89   : > { %v299_v48 = vld [vmem:[#allocation2] sm:$0x3] }
  0x8a   : > { %v300_v49 = vsel %vm248_vm0, %v299_v48, 0.0 }
  0x8b   : > { %v301_v50 = vrot.slane %v300_v49, 4 }
  0x8d   : > { %v302_v51 = vadd.f32 %v301_v50, %v300_v49 }
  0x8f   : > { %v303_v52 = vrot.slane %v302_v51, 2 }
  0x91   : > { %v304_v53 = vadd.f32 %v303_v52, %v302_v51 }
  0x93   : > { %v305_v54 = vrot.slane %v304_v53, 1 }
  0x95   : > { %v306_v55 = vadd.f32 %v305_v54, %v304_v53 }
  0x97   : > { %v308_v56 = vsel %vm307_vm5, %v306_v55, 0.0 }
  0x98   : > { %309 = vadd.xlane.f32.xlu0 %v308_v56 }
 0x125   : > { %v310_v57 = vpop.xlane.xlu0 %309 }
 0x126   : > { %v311_v58 = vrot.slane %v310_v57, 4 }
 0x128   : > { %v312_v59 = vadd.f32 %v311_v58, %v310_v57 }
 0x12a   : > { %v313_v60 = vrot.slane %v312_v59, 2 }
 0x12c   : > { %v314_v61 = vadd.f32 %v313_v60, %v312_v59 }
 0x12e   : > { %v315_v62 = vrot.slane %v314_v61, 1 }
 0x130   : > { %v316_v63 = vadd.f32 %v315_v62, %v314_v61 }
 0x132   : > { %444 = vpush %v316_v63 }
 0x163   : > { %s445_s8 = spop %444 }
 0x164   : > { %v318_v0 = vstv %s445_s8 }
 0x165   : > { %320 = vst.msk [vmem:[%s237_s5] sm:$0x1] %vm319_vm6, %v318_v0 }
 0x166 PF: > { %s18_s14 = sadd.s32 1, %s633_s14   ;;  %s842_s9 = smov %s617_s10 }
 0x167   : > { %p15_p9 = scmp.ge.s32.totalorder %s18_s14, 4   ;;  %s843_s10 = smov %s621_s11 }
 0x168   : > { %s844_s11 = smov %s704_s21  ;;  %s845_s12 = smov %s629_s13 }
 0x169   : > { %s846_s13 = smov %s848_s16  ;;  %17 = sbr.rel (!%p15_p9) target bundleno = 6 (0x6), region = 89 }
 0x170   :  { %344 = vsyncpa [#allocation4], 1 }
 0x171   :  { %346 = vsyncpa [#allocation4 + $0x1], 1 }
 0x172   :  { %347 = vsyncpa [#allocation6], 1 }
 0x173   :  { %349 = vsyncpa [#allocation6 + $0x1], 1 }

</bundles_post_ra>
